<compile_context>
chip_gen: v5e
topology: v5e:2x2
jax: 0.10.0
libtpu: 0.0.40
codegen_flags: <defaults>
</compile_context>

<pallas_src>
import jax
import jax.numpy as jnp
from jax import lax
from jax.experimental import pallas as pl
from jax.experimental.pallas import tpu as pltpu


def _l2norm_kernel(scale_ref, x_ref, o_ref):
    # scale_ref: (1,) f32 in SMEM; x_ref / o_ref: (tb, D) tile in VMEM.
    x = x_ref[...].astype(jnp.float32)
    # Row-wise sum of squares -> (tb, 1): lane reduction.
    ssq = jnp.sum(x * x, axis=1, keepdims=True)
    # Fold the learned scale into the per-row reciprocal norm: one rsqrt on
    # (tb, 1) elements (EUP) + one full-tile multiply (VALU). No full-tile
    # divide, no separate scale pass.
    inv = scale_ref[0] * lax.rsqrt(ssq)
    # NOTE: no epsilon — matches torch.norm-based division exactly
    # (an all-zero row gives NaN in both implementations).
    o_ref[...] = (x * inv).astype(o_ref.dtype)


def _round_up(n, m):
    return ((n + m - 1) // m) * m


def normalization_layer(x, norm_s, *, vmem_budget_bytes=16 * 1024 * 1024):
    """scale * x / ||x||_2 along dim=1 of a (B, D) tensor (NormalizationLayer.forward)."""
    B, D = x.shape
    itemsize = jnp.dtype(x.dtype).itemsize
    # Sublane-packing alignment: 8 rows (f32), 16 (bf16), 32 (int8/fp8).
    align = 8 * max(1, 4 // itemsize)

    # Largest batch tile whose double-buffered footprint
    # (2 arrays x 2 pipeline buffers x tb*D*itemsize) stays inside the budget.
    # 16 MiB footprint + 32 MiB scoped limit is safe on v5e/v6e and v7x
    # (64 MiB physical per TC). Cap at 2048 rows — already >1 MiB tiles for
    # any realistic D, i.e. well past the ~85%-of-roofline tile size.
    bytes_per_row = 4 * D * itemsize
    max_tb = max(align, (vmem_budget_bytes // bytes_per_row) // align * align)
    tb = min(max_tb, 2048, _round_up(B, align))

    # Pad the batch to a multiple of tb (no partial-tile masking needed);
    # padded rows are 1.0 (finite norm) and sliced off after the call.
    Bp = _round_up(B, tb)
    if Bp != B:
        x_in = jnp.concatenate([x, jnp.ones((Bp - B, D), dtype=x.dtype)], axis=0)
    else:
        x_in = x

    scale = jnp.asarray(norm_s, dtype=jnp.float32).reshape((1,))

    out = pl.pallas_call(
        _l2norm_kernel,
        out_shape=jax.ShapeDtypeStruct((Bp, D), x.dtype),
        grid=(Bp // tb,),
        in_specs=[
            pl.BlockSpec(memory_space=pltpu.MemorySpace.SMEM),   # scalar scale
            pl.BlockSpec((tb, D), lambda i: (i, 0)),             # x tile
        ],
        out_specs=pl.BlockSpec((tb, D), lambda i: (i, 0)),
        compiler_params=pltpu.CompilerParams(
            dimension_semantics=("parallel",),   # shards batch axis across v7x's 2 TCs
            vmem_limit_bytes=32 * 1024 * 1024,   # explicit scoped VMEM for large tiles
        ),
    )(scale, x_in)

    # TODO(synk): if D grows to tens of thousands, add a second 'arbitrary'
    # grid axis over D with an SSQ accumulator instead of loading full rows.
    return out[:B] if Bp != B else out


if __name__ == "__main__":
    key = jax.random.PRNGKey(0)
    # Small shapes consistent with the module; non-multiple batch exercises
    # the padding path.
    B, D = 10, 32
    x = jax.random.normal(key, (B, D), dtype=jnp.float32)

    # Same init as the PyTorch module (norm_s = 1.0, learnable Parameter).
    norm_s = 1.0

    out = jax.block_until_ready(normalization_layer(x, norm_s))

    # Pure-JAX reference.
    ref = norm_s * x / jnp.linalg.norm(x, axis=1, keepdims=True)
    assert out.shape == x.shape and out.dtype == x.dtype
    assert jnp.allclose(out, ref, atol=1e-5, rtol=1e-5)

    print("KERNEL_OK")
</pallas_src>

<mosaic_0001>
module attributes {stable_mosaic.version = 11 : i64} {
  func.func @_l2norm_kernel(%arg0: i32, %arg1: memref<1xf32, #tpu.memory_space<smem>>, %arg2: memref<16x32xf32, #tpu.memory_space<vmem>>, %arg3: memref<16x32xf32, #tpu.memory_space<vmem>>) attributes {dimension_semantics = [#tpu.dimension_semantics<parallel>], iteration_bounds = array<i64: 1>, scalar_prefetch = 0 : i64, scratch_operands = 0 : i64, tpu.core_type = #tpu.core_type<tc>, window_params = [{transform_indices = @transform_0, window_bounds = array<i64: 1>}, {transform_indices = @transform_1, window_bounds = array<i64: 16, 32>}, {transform_indices = @transform_2, window_bounds = array<i64: 16, 32>}]} {
    %c0 = arith.constant 0 : index
    %c0_0 = arith.constant 0 : index
    %0 = vector.load %arg2[%c0, %c0_0] : memref<16x32xf32, #tpu.memory_space<vmem>>, vector<16x32xf32>
    %1 = arith.mulf %0, %0 : vector<16x32xf32>
    %cst = arith.constant dense<0.000000e+00> : vector<16xf32>
    %2 = vector.multi_reduction <add>, %1, %cst [1] : vector<16x32xf32> to vector<16xf32>
    %3 = vector.shape_cast %2 : vector<16xf32> to vector<16x1xf32>
    %c0_1 = arith.constant 0 : index
    %4 = memref.load %arg1[%c0_1] : memref<1xf32, #tpu.memory_space<smem>>
    %5 = math.rsqrt %3 : vector<16x1xf32>
    %6 = vector.broadcast %4 : f32 to vector<16x1xf32>
    %7 = arith.mulf %6, %5 : vector<16x1xf32>
    %8 = vector.broadcast %7 : vector<16x1xf32> to vector<16x32xf32>
    %9 = arith.mulf %0, %8 : vector<16x32xf32>
    %c0_2 = arith.constant 0 : index
    %c0_3 = arith.constant 0 : index
    %10 = vector.load %arg3[%c0_2, %c0_3] : memref<16x32xf32, #tpu.memory_space<vmem>>, vector<16x32xf32>
    tpu.vector_store %arg3[%c0_2, %c0_3], %9 {strides = array<i32>} : memref<16x32xf32, #tpu.memory_space<vmem>>, vector<16x32xf32>,
    return
  }
  func.func @transform_0(%arg0: i32) -> i32 {
    %c0_i32 = arith.constant 0 : i32
    %c0_i32_0 = arith.constant 0 : i32
    return %c0_i32 : i32
  }
  func.func @transform_1(%arg0: i32) -> (i32, i32) {
    %c0_i32 = arith.constant 0 : i32
    %c0_i32_0 = arith.constant 0 : i32
    return %arg0, %c0_i32 : i32, i32
  }
  func.func @transform_2(%arg0: i32) -> (i32, i32) {
    %c0_i32 = arith.constant 0 : i32
    %c0_i32_0 = arith.constant 0 : i32
    return %arg0, %c0_i32 : i32, i32
  }
}

</mosaic_0001>

<bundles_post_ra>
// kernel: tpu_custom_call.1
= control target key start
LH: loop header
LB: loop body
LE: loop exit
PB: predicated region body
PF: predicated region fallthrough
CT: control target
= control target key end

     0   :  { %8 = vsyncpa [#allocation4], 0  ;;  %s185_s0 = inlined_call_operand.<no memory space> [shape: f32[1], index: 0, kind: input, shape index: {}]   ;;  %s186_s1 = inlined_call_operand.hbm [shape: f32[16,32], index: 1, kind: input, shape index: {}]   ;;  %s187_s2 = inlined_call_operand.hbm [shape: f32[16,32], index: 2, kind: output, shape index: {}]  }
   0x1   :  { %9 = vsyncpa [#allocation5], 0  ;;  %s16_s11 = sshll.u32 %s186_s1, 4  ;;  %s147_s12 = smov [#allocation3]   ;;  %s17_s11 = int_to_ptr.hbm [resolvable:$true] %s16_s11 }
   0x2   :  { %s18_s13 = sshll.u32 %s147_s12, 4  ;;  %s148_s14 = smov 128   ;;  %s19_s13 = int_to_ptr.vmem [resolvable:$true] %s18_s13 }
   0x3   :  { %s149_s15 = smov 8  }
   0x4   :  { %24 = dma.hbm_to_vmem [thread:$0]  %s17_s11, 256, %s19_s13, [#allocation4], %s148_s14, %s148_s14, %s149_s15  }
   0x5   :  { %143 = dma.done.wait [#allocation4], 256  }
   0x6   :  { %144 = vsyncadd [#allocation4], 4294967040  ;;  %v29_v0 = vld [vmem:[#allocation3] sm:$0xff]  ;;  %vm33_vm0 = vcmask 261120   ;;  %v30_v2 = vld [vmem:[#allocation3 + $0x8] sm:$0xff]  ;;  %v61_v15 = vstv %s185_s0  ;;  %s150_s17 = smov [#allocation6]  }
   0x7   :  { %v31_v1 = vmul.f32 %v29_v0, %v29_v0  ;;  %v32_v4 = vmul.f32 %v30_v2, %v30_v2  ;;  %s72_s18 = sshll.u32 %s150_s17, 4  ;;  %s74_s0 = sshll.u32 %s187_s2, 4  ;;  %s73_s18 = int_to_ptr.vmem [resolvable:$true] %s72_s18  ;;  %s75_s0 = int_to_ptr.hbm [resolvable:$true] %s74_s0 }
   0x9   :  { %v34_v3 = vsel %vm33_vm0, %v31_v1, 0.0  ;;  %v37_v5 = vsel %vm33_vm0, %v32_v4, 0.0 }
   0xa   :  { %35 = vadd.xlane.f32.xlu0 %v34_v3 }
  0x12   :  { %38 = vadd.xlane.f32.xlu0 %v37_v5 }
  0x7d   :  { %v36_v6 = vpop.xlane.xlu0 %35 }
  0x7e   :  { %91 = vrsqrt.f32 %v36_v6  ;;  %vm47_vm2 = vweird.f32 %v36_v6 }
  0x84   :  { %v92_v7 = vpop.eup %91 }
  0x85   :  { %v42_v8 = vmul.f32 %v92_v7, %v36_v6  ;;  %v39_v9 = vpop.xlane.xlu0 %38  ;;  %vm48_vm1 = vweird.f32 %v92_v7 }
  0x86   :  { %93 = vrsqrt.f32 %v39_v9  ;;  %vm49_vm3 = vmor %vm47_vm2, %vm48_vm1  ;;  %vm57_vm5 = vweird.f32 %v39_v9 }
  0x87   :  { %v43_v10 = vmul.f32 %v92_v7, %v42_v8 }
  0x89   :  { %v44_v11 = vmul.f32 0.5, %v43_v10 }
  0x8b   :  { %v45_v12 = vsub.f32 1.5, %v44_v11 }
  0x8c   :  { %v94_v13 = vpop.eup %93 }
  0x8d   :  { %v46_v14 = vmul.f32 %v92_v7, %v45_v12  ;;  %v52_v16 = vmul.f32 %v94_v13, %v39_v9  ;;  %vm58_vm4 = vweird.f32 %v94_v13 }
  0x8e   :  { %vm59_vm6 = vmor %vm57_vm5, %vm58_vm4 }
  0x8f   :  { %v50_v17 = vsel %vm49_vm3, %v92_v7, %v46_v14  ;;  %v53_v18 = vmul.f32 %v94_v13, %v52_v16 }
  0x90   :  { %v62_v19 = vmul.f32 %v61_v15, %v50_v17 }
  0x91   :  { %v54_v20 = vmul.f32 0.5, %v53_v18 }
  0x92   :  { %v64_v21 = vmul.f32 %v62_v19, %v29_v0 }
  0x93   :  { %v55_v22 = vsub.f32 1.5, %v54_v20 }
  0x94   :  { %66 = vst.msk [vmem:[#allocation6] sm:$0xff] %vm33_vm0, %v64_v21 }
  0x95   :  { %v56_v23 = vmul.f32 %v94_v13, %v55_v22 }
  0x97   :  { %v60_v24 = vsel %vm59_vm6, %v94_v13, %v56_v23 }
  0x98   :  { %v63_v25 = vmul.f32 %v61_v15, %v60_v24 }
  0x9a   :  { %v65_v26 = vmul.f32 %v63_v25, %v30_v2 }
  0x9c   :  { %67 = vst.msk [vmem:[#allocation6 + $0x8] sm:$0xff] %vm33_vm0, %v65_v26 }
  0x9d   :  { %80 = dma.vmem_to_hbm [thread:$0]  %s73_s18, 256, %s75_s0, [#allocation5], %s148_s14, %s148_s14, %s149_s15  }
  0x9e   :  { %145 = dma.done.wait [#allocation5], 256  }
  0x9f   :  { %146 = vsyncadd [#allocation5], 4294967040 }
  0xa0   :  { %85 = vsyncpa [#allocation4], 1 }
  0xa1   :  { %86 = vsyncpa [#allocation5], 1 }

</bundles_post_ra>
